<compile_context>
chip_gen: v6e
topology: v6e:2x2x1
jax: 0.10.0
libtpu: 0.0.40
codegen_flags: <defaults>
</compile_context>

<pallas_src>
import functools

import jax
import jax.numpy as jnp
import numpy as np
from jax.experimental import pallas as pl
from jax.experimental.pallas import tpu as pltpu


def _resblock_kernel(xe_ref, xo_ref, wres_ref, w1a_ref, w2_ref, b1_ref, b2_ref, o_ref,
                     *, c_in, t_half):
    f32 = jnp.float32
    bf16 = jnp.bfloat16

    xe = xe_ref[...].astype(f32)          # (C_in, Lb)  even time steps (batch fused in lanes)
    xo = xo_ref[...].astype(f32)          # (C_in, Lb)  odd  time steps
    lb = xe.shape[-1]                     # Lb = batch_block * T//2

    wres = wres_ref[...]                  # (C_out, C_in)   bf16
    w1a = w1a_ref[...]                    # (3*C_in, C_in)  bf16, conv1 taps stacked on rows
    w2 = w2_ref[...]                      # (C_out, C_in)   bf16
    b1 = b1_ref[...]                      # (C_in, 1)       f32  (tiny VMEM blocks; minor cost)
    b2 = b2_ref[...]                      # (C_out, 1)      f32

    # Per-batch-segment boundary masks along the fused lane axis (segment length = t_half).
    pos = jax.lax.broadcasted_iota(jnp.int32, (c_in, lb), 1) % t_half
    first = pos == 0
    last = pos == (t_half - 1)

    def shift_right(v):   # out[:, j] = v[:, j-1]; zero at the first column of each segment
        if lb % 128 == 0:
            s = pltpu.roll(v, shift=1, axis=-1)        # XLU lane rotate (free slot)
        else:                                          # small / unaligned lane extents
            s = jnp.concatenate([jnp.zeros((c_in, 1), v.dtype), v[:, :-1]], axis=-1)
        return jnp.where(first, 0.0, s)

    def shift_left(v):    # out[:, j] = v[:, j+1]; zero at the last column of each segment
        if lb % 128 == 0:
            s = pltpu.roll(v, shift=-1, axis=-1)
        else:
            s = jnp.concatenate([v[:, 1:], jnp.zeros((c_in, 1), v.dtype)], axis=-1)
        return jnp.where(last, 0.0, s)

    leaky = lambda v: jnp.where(v > 0, v, 0.2 * v)     # LeakyReLU(0.2), kept in f32 (VPU)

    # ---- residual path: AvgPool1d(2) first (linear), then 1x1 res_conv (bias=False) ----
    x_pool = 0.5 * (xe + xo)                                               # (C_in, Lb)
    res = jnp.dot(wres, x_pool.astype(bf16), preferred_element_type=f32)   # (C_out, Lb)

    # ---- main path ----
    ae = leaky(xe)
    ao = leaky(xo)
    pe = jnp.dot(w1a, ae.astype(bf16), preferred_element_type=f32)         # (3*C_in, Lb)
    po = jnp.dot(w1a, ao.astype(bf16), preferred_element_type=f32)         # (3*C_in, Lb)
    # conv1 (k=3, pad=1) split by output-time parity (a = LeakyReLU(x)):
    #   h[2j]   = w0 @ a[2j-1] + w1 @ a[2j]   + w2 @ a[2j+1] + b1
    #   h[2j+1] = w0 @ a[2j]   + w1 @ a[2j+1] + w2 @ a[2j+2] + b1
    h_e = shift_right(po[0:c_in]) + pe[c_in:2 * c_in] + po[2 * c_in:3 * c_in] + b1
    h_o = pe[0:c_in] + po[c_in:2 * c_in] + shift_left(pe[2 * c_in:3 * c_in]) + b1
    # LeakyReLU, then fold AvgPool1d(2) *before* conv2 (pool weights sum to 1 -> bias unchanged).
    h_pool = 0.5 * (leaky(h_e) + leaky(h_o))                               # (C_in, Lb)
    y = jnp.dot(w2, h_pool.astype(bf16), preferred_element_type=f32) + b2  # (C_out, Lb)

    o_ref[...] = (y + res).astype(o_ref.dtype)


def _pick_batch_block(batch, t_half, c_in, c_out, budget_bytes=8 * 1024 * 1024):
    """Largest batch block whose fused-lane slab fits a conservative VMEM budget.

    Blocks smaller than the full batch must give a 128-multiple lane extent (TPU tiling rule).
    """
    bytes_per_lane = 4 * (12 * c_in + 4 * c_out)   # double-buffered in/out + live f32 temps
    for bblk in range(batch, 0, -1):
        if batch % bblk:
            continue
        lanes = bblk * t_half
        if bblk != batch and lanes % 128 != 0:
            continue
        if lanes * bytes_per_lane <= budget_bytes:
            return bblk
    return batch


def speaker_encoder_resblock(x, wres, w1, b1, w2, b2):
    """x: (B, C_in, T) float32 with T even. Returns (B, C_out, T // 2)."""
    B, C_in, T = x.shape
    assert T % 2 == 0, "even T assumed (PyTorch AvgPool1d(2) drops a trailing odd step)"
    C_out = wres.shape[0]
    Tp = T // 2

    # Layout plumbing (plain XLA, outside the kernel): de-interleave time into even/odd
    # streams and fuse batch into the lane axis -> kernel sees lane-dense (C, B*Tp) slabs.
    xt = jnp.transpose(x, (1, 0, 2))                     # (C_in, B, T)
    xe = xt[:, :, 0::2].reshape(C_in, B * Tp)
    xo = xt[:, :, 1::2].reshape(C_in, B * Tp)

    # Weights: stack the three conv1 taps on rows; cast matmul weights to bf16 once.
    bf16 = jnp.bfloat16
    w1_all = jnp.concatenate([w1[:, :, 0], w1[:, :, 1], w1[:, :, 2]], axis=0).astype(bf16)
    wres_bf = wres.astype(bf16)
    w2_bf = w2.astype(bf16)
    b1c = b1.reshape(C_in, 1).astype(jnp.float32)
    b2c = b2.reshape(C_out, 1).astype(jnp.float32)

    bblk = _pick_batch_block(B, Tp, C_in, C_out)
    Lb = bblk * Tp
    grid = (B // bblk,)

    full = lambda shape: pl.BlockSpec(shape, lambda i: (0, 0))

    out2d = pl.pallas_call(
        functools.partial(_resblock_kernel, c_in=C_in, t_half=Tp),
        out_shape=jax.ShapeDtypeStruct((C_out, B * Tp), x.dtype),
        grid_spec=pltpu.PrefetchScalarGridSpec(
            num_scalar_prefetch=0,
            grid=grid,
            in_specs=[
                pl.BlockSpec((C_in, Lb), lambda i: (0, i)),   # xe (even time steps)
                pl.BlockSpec((C_in, Lb), lambda i: (0, i)),   # xo (odd time steps)
                full((C_out, C_in)),                          # wres (bf16)
                full((3 * C_in, C_in)),                       # conv1 taps stacked (bf16)
                full((C_out, C_in)),                          # w2 (bf16)
                full((C_in, 1)),                              # b1 (f32)
                full((C_out, 1)),                             # b2 (f32)
            ],
            out_specs=pl.BlockSpec((C_out, Lb), lambda i: (0, i)),
        ),
        compiler_params=pltpu.CompilerParams(dimension_semantics=("parallel",)),
    )(xe, xo, wres_bf, w1_all, w2_bf, b1c, b2c)

    return jnp.transpose(out2d.reshape(C_out, B, Tp), (1, 0, 2))   # (B, C_out, Tp)


def ref_forward(x, wres, w1, b1, w2, b2):
    """Pure-JAX (f32) reference mirroring the PyTorch forward."""
    res = jnp.einsum('oc,bct->bot', wres, x)
    res = 0.5 * (res[:, :, 0::2] + res[:, :, 1::2])
    a = jnp.where(x > 0, x, 0.2 * x)
    ap = jnp.pad(a, ((0, 0), (0, 0), (1, 0)))[:, :, :-1]
    an = jnp.pad(a, ((0, 0), (0, 0), (0, 1)))[:, :, 1:]
    h = (jnp.einsum('oc,bct->bot', w1[:, :, 0], ap)
         + jnp.einsum('oc,bct->bot', w1[:, :, 1], a)
         + jnp.einsum('oc,bct->bot', w1[:, :, 2], an)
         + b1[None, :, None])
    h = jnp.where(h > 0, h, 0.2 * h)
    y = jnp.einsum('oc,bct->bot', w2, h) + b2[None, :, None]
    y = 0.5 * (y[:, :, 0::2] + y[:, :, 1::2])
    return y + res


if __name__ == "__main__":
    B, C_in, C_out, T = 2, 4, 8, 16

    key = jax.random.PRNGKey(0)
    kx, k1, k2, k3, k4, k5 = jax.random.split(key, 6)
    x = jax.random.normal(kx, (B, C_in, T), jnp.float32)

    # Deterministic synthetic parameters (shapes match the nn.Conv1d weights).
    wres = jax.random.normal(k1, (C_out, C_in), jnp.float32) * 0.3   # res_conv (1x1, no bias)
    w1 = jax.random.normal(k2, (C_in, C_in, 3), jnp.float32) * 0.3   # conv1 (k=3, pad=1)
    b1 = jax.random.normal(k3, (C_in,), jnp.float32) * 0.1
    w2 = jax.random.normal(k4, (C_out, C_in), jnp.float32) * 0.3     # conv2 (1x1)
    b2 = jax.random.normal(k5, (C_out,), jnp.float32) * 0.1

    out = jax.block_until_ready(speaker_encoder_resblock(x, wres, w1, b1, w2, b2))

    ref = ref_forward(x, wres, w1, b1, w2, b2)
    assert out.shape == (B, C_out, T // 2), out.shape
    # bf16 MXU operands vs. an f32 reference -> slightly looser tolerance.
    np.testing.assert_allclose(np.asarray(out), np.asarray(ref), rtol=5e-2, atol=5e-2)

    print("KERNEL_OK")
</pallas_src>

<mosaic_0001>
module attributes {stable_mosaic.version = 11 : i64} {
  func.func @_resblock_kernel(%arg0: i32, %arg1: memref<4x16xf32, #tpu.memory_space<vmem>>, %arg2: memref<4x16xf32, #tpu.memory_space<vmem>>, %arg3: memref<8x4xbf16, #tpu.memory_space<vmem>>, %arg4: memref<12x4xbf16, #tpu.memory_space<vmem>>, %arg5: memref<8x4xbf16, #tpu.memory_space<vmem>>, %arg6: memref<4x1xf32, #tpu.memory_space<vmem>>, %arg7: memref<8x1xf32, #tpu.memory_space<vmem>>, %arg8: memref<8x16xf32, #tpu.memory_space<vmem>>) attributes {dimension_semantics = [#tpu.dimension_semantics<parallel>], iteration_bounds = array<i64: 1>, scalar_prefetch = 0 : i64, scratch_operands = 0 : i64, tpu.core_type = #tpu.core_type<tc>, window_params = [{transform_indices = @transform_0, window_bounds = array<i64: 4, 16>}, {transform_indices = @transform_1, window_bounds = array<i64: 4, 16>}, {pipeline_mode = #tpu.pipeline_mode<synchronous>, transform_indices = @transform_2, window_bounds = array<i64: 8, 4>}, {pipeline_mode = #tpu.pipeline_mode<synchronous>, transform_indices = @transform_3, window_bounds = array<i64: 12, 4>}, {pipeline_mode = #tpu.pipeline_mode<synchronous>, transform_indices = @transform_4, window_bounds = array<i64: 8, 4>}, {pipeline_mode = #tpu.pipeline_mode<synchronous>, transform_indices = @transform_5, window_bounds = array<i64: 4, 1>}, {pipeline_mode = #tpu.pipeline_mode<synchronous>, transform_indices = @transform_6, window_bounds = array<i64: 8, 1>}, {transform_indices = @transform_7, window_bounds = array<i64: 8, 16>}]} {
    %c0 = arith.constant 0 : index
    %c0_0 = arith.constant 0 : index
    %0 = vector.load %arg1[%c0, %c0_0] : memref<4x16xf32, #tpu.memory_space<vmem>>, vector<4x16xf32>
    %c0_1 = arith.constant 0 : index
    %c0_2 = arith.constant 0 : index
    %1 = vector.load %arg2[%c0_1, %c0_2] : memref<4x16xf32, #tpu.memory_space<vmem>>, vector<4x16xf32>
    %c0_3 = arith.constant 0 : index
    %c0_4 = arith.constant 0 : index
    %2 = vector.load %arg3[%c0_3, %c0_4] : memref<8x4xbf16, #tpu.memory_space<vmem>>, vector<8x4xbf16>
    %c0_5 = arith.constant 0 : index
    %c0_6 = arith.constant 0 : index
    %3 = vector.load %arg4[%c0_5, %c0_6] : memref<12x4xbf16, #tpu.memory_space<vmem>>, vector<12x4xbf16>
    %c0_7 = arith.constant 0 : index
    %c0_8 = arith.constant 0 : index
    %4 = vector.load %arg5[%c0_7, %c0_8] : memref<8x4xbf16, #tpu.memory_space<vmem>>, vector<8x4xbf16>
    %c0_9 = arith.constant 0 : index
    %c0_10 = arith.constant 0 : index
    %5 = vector.load %arg6[%c0_9, %c0_10] : memref<4x1xf32, #tpu.memory_space<vmem>>, vector<4x1xf32>
    %c0_11 = arith.constant 0 : index
    %c0_12 = arith.constant 0 : index
    %6 = vector.load %arg7[%c0_11, %c0_12] : memref<8x1xf32, #tpu.memory_space<vmem>>, vector<8x1xf32>
    %7 = tpu.iota {dimensions = array<i32: 1>} : vector<4x16xi32>
    %c8_i32 = arith.constant 8 : i32
    %c0_i32 = arith.constant 0 : i32
    %8 = arith.cmpi eq, %c8_i32, %c0_i32 : i32
    %c1_i32 = arith.constant 1 : i32
    %9 = arith.select %8, %c1_i32, %c8_i32 : i32
    %10 = vector.broadcast %9 : i32 to vector<4x16xi32>
    %11 = arith.remsi %7, %10 : vector<4x16xi32>
    %c0_i32_13 = arith.constant 0 : i32
    %12 = vector.broadcast %c0_i32_13 : i32 to vector<4x16xi32>
    %13 = arith.cmpi ne, %11, %12 : vector<4x16xi32>
    %c0_i32_14 = arith.constant 0 : i32
    %14 = vector.broadcast %c0_i32_14 : i32 to vector<4x16xi32>
    %15 = arith.cmpi slt, %11, %14 : vector<4x16xi32>
    %c0_i32_15 = arith.constant 0 : i32
    %16 = arith.cmpi slt, %9, %c0_i32_15 : i32
    %17 = vector.broadcast %16 : i1 to vector<4x16xi1>
    %18 = vector.broadcast %17 : vector<4x16xi1> to vector<4x16xi1>
    %19 = arith.xori %15, %18 : vector<4x16xi1>
    %20 = arith.andi %19, %13 : vector<4x16xi1>
    %21 = vector.broadcast %9 : i32 to vector<4x16xi32>
    %22 = arith.addi %11, %21 : vector<4x16xi32>
    %23 = arith.select %20, %22, %11 : vector<4x16xi1>, vector<4x16xi32>
    %c0_i32_16 = arith.constant 0 : i32
    %24 = vector.broadcast %c0_i32_16 : i32 to vector<4x16xi32>
    %25 = arith.cmpi eq, %23, %24 : vector<4x16xi32>
    %c7_i32 = arith.constant 7 : i32
    %26 = vector.broadcast %c7_i32 : i32 to vector<4x16xi32>
    %27 = arith.cmpi eq, %23, %26 : vector<4x16xi32>
    %28 = arith.addf %0, %1 : vector<4x16xf32>
    %cst = arith.constant 5.000000e-01 : f32
    %29 = vector.broadcast %cst : f32 to vector<4x16xf32>
    %30 = arith.mulf %29, %28 : vector<4x16xf32>
    %31 = arith.truncf %30 : vector<4x16xf32> to vector<4x16xbf16>
    %cst_17 = arith.constant dense<0.000000e+00> : vector<8x16xf32>
    %32 = tpu.matmul %2, %31, %cst_17 {dimension_numbers = #tpu.dot_dimension_numbers<[1], [0], [0], [1], [0, 0, 1, 1], [], []>} : vector<8x4xbf16>, vector<4x16xbf16>, vector<8x16xf32> -> vector<8x16xf32>
    %cst_18 = arith.constant 0.000000e+00 : f32
    %33 = vector.broadcast %cst_18 : f32 to vector<4x16xf32>
    %34 = arith.cmpf ogt, %0, %33 : vector<4x16xf32>
    %cst_19 = arith.constant 2.000000e-01 : f32
    %35 = vector.broadcast %cst_19 : f32 to vector<4x16xf32>
    %36 = arith.mulf %35, %0 : vector<4x16xf32>
    %37 = arith.select %34, %0, %36 : vector<4x16xi1>, vector<4x16xf32>
    %cst_20 = arith.constant 0.000000e+00 : f32
    %38 = vector.broadcast %cst_20 : f32 to vector<4x16xf32>
    %39 = arith.cmpf ogt, %1, %38 : vector<4x16xf32>
    %cst_21 = arith.constant 2.000000e-01 : f32
    %40 = vector.broadcast %cst_21 : f32 to vector<4x16xf32>
    %41 = arith.mulf %40, %1 : vector<4x16xf32>
    %42 = arith.select %39, %1, %41 : vector<4x16xi1>, vector<4x16xf32>
    %43 = arith.truncf %37 : vector<4x16xf32> to vector<4x16xbf16>
    %cst_22 = arith.constant dense<0.000000e+00> : vector<12x16xf32>
    %44 = tpu.matmul %3, %43, %cst_22 {dimension_numbers = #tpu.dot_dimension_numbers<[1], [0], [0], [1], [0, 0, 1, 1], [], []>} : vector<12x4xbf16>, vector<4x16xbf16>, vector<12x16xf32> -> vector<12x16xf32>
    %45 = arith.truncf %42 : vector<4x16xf32> to vector<4x16xbf16>
    %cst_23 = arith.constant dense<0.000000e+00> : vector<12x16xf32>
    %46 = tpu.matmul %3, %45, %cst_23 {dimension_numbers = #tpu.dot_dimension_numbers<[1], [0], [0], [1], [0, 0, 1, 1], [], []>} : vector<12x4xbf16>, vector<4x16xbf16>, vector<12x16xf32> -> vector<12x16xf32>
    %47 = vector.extract_strided_slice %46 {offsets = [0, 0], sizes = [4, 16], strides = [1, 1]} : vector<12x16xf32> to vector<4x16xf32>
    %cst_24 = arith.constant 0.000000e+00 : f32
    %48 = vector.broadcast %cst_24 : f32 to vector<4x1xf32>
    %49 = vector.extract_strided_slice %47 {offsets = [0, 0], sizes = [4, 15], strides = [1, 1]} : vector<4x16xf32> to vector<4x15xf32>
    %50 = tpu.concatenate %48, %49 in 1 : vector<4x1xf32>, vector<4x15xf32> -> vector<4x16xf32>
    %cst_25 = arith.constant 0.000000e+00 : f32
    %51 = vector.broadcast %cst_25 : f32 to vector<4x16xf32>
    %52 = arith.select %25, %51, %50 : vector<4x16xi1>, vector<4x16xf32>
    %53 = vector.extract_strided_slice %44 {offsets = [4, 0], sizes = [4, 16], strides = [1, 1]} : vector<12x16xf32> to vector<4x16xf32>
    %54 = arith.addf %52, %53 : vector<4x16xf32>
    %55 = vector.extract_strided_slice %46 {offsets = [8, 0], sizes = [4, 16], strides = [1, 1]} : vector<12x16xf32> to vector<4x16xf32>
    %56 = arith.addf %54, %55 : vector<4x16xf32>
    %57 = vector.broadcast %5 : vector<4x1xf32> to vector<4x16xf32>
    %58 = arith.addf %56, %57 : vector<4x16xf32>
    %59 = vector.extract_strided_slice %44 {offsets = [0, 0], sizes = [4, 16], strides = [1, 1]} : vector<12x16xf32> to vector<4x16xf32>
    %60 = vector.extract_strided_slice %46 {offsets = [4, 0], sizes = [4, 16], strides = [1, 1]} : vector<12x16xf32> to vector<4x16xf32>
    %61 = arith.addf %59, %60 : vector<4x16xf32>
    %62 = vector.extract_strided_slice %44 {offsets = [8, 0], sizes = [4, 16], strides = [1, 1]} : vector<12x16xf32> to vector<4x16xf32>
    %63 = vector.extract_strided_slice %62 {offsets = [0, 1], sizes = [4, 15], strides = [1, 1]} : vector<4x16xf32> to vector<4x15xf32>
    %cst_26 = arith.constant 0.000000e+00 : f32
    %64 = vector.broadcast %cst_26 : f32 to vector<4x1xf32>
    %65 = tpu.concatenate %63, %64 in 1 : vector<4x15xf32>, vector<4x1xf32> -> vector<4x16xf32>
    %cst_27 = arith.constant 0.000000e+00 : f32
    %66 = vector.broadcast %cst_27 : f32 to vector<4x16xf32>
    %67 = arith.select %27, %66, %65 : vector<4x16xi1>, vector<4x16xf32>
    %68 = arith.addf %61, %67 : vector<4x16xf32>
    %69 = vector.broadcast %5 : vector<4x1xf32> to vector<4x16xf32>
    %70 = arith.addf %68, %69 : vector<4x16xf32>
    %cst_28 = arith.constant 0.000000e+00 : f32
    %71 = vector.broadcast %cst_28 : f32 to vector<4x16xf32>
    %72 = arith.cmpf ogt, %58, %71 : vector<4x16xf32>
    %cst_29 = arith.constant 2.000000e-01 : f32
    %73 = vector.broadcast %cst_29 : f32 to vector<4x16xf32>
    %74 = arith.mulf %73, %58 : vector<4x16xf32>
    %75 = arith.select %72, %58, %74 : vector<4x16xi1>, vector<4x16xf32>
    %cst_30 = arith.constant 0.000000e+00 : f32
    %76 = vector.broadcast %cst_30 : f32 to vector<4x16xf32>
    %77 = arith.cmpf ogt, %70, %76 : vector<4x16xf32>
    %cst_31 = arith.constant 2.000000e-01 : f32
    %78 = vector.broadcast %cst_31 : f32 to vector<4x16xf32>
    %79 = arith.mulf %78, %70 : vector<4x16xf32>
    %80 = arith.select %77, %70, %79 : vector<4x16xi1>, vector<4x16xf32>
    %81 = arith.addf %75, %80 : vector<4x16xf32>
    %cst_32 = arith.constant 5.000000e-01 : f32
    %82 = vector.broadcast %cst_32 : f32 to vector<4x16xf32>
    %83 = arith.mulf %82, %81 : vector<4x16xf32>
    %84 = arith.truncf %83 : vector<4x16xf32> to vector<4x16xbf16>
    %cst_33 = arith.constant dense<0.000000e+00> : vector<8x16xf32>
    %85 = tpu.matmul %4, %84, %cst_33 {dimension_numbers = #tpu.dot_dimension_numbers<[1], [0], [0], [1], [0, 0, 1, 1], [], []>} : vector<8x4xbf16>, vector<4x16xbf16>, vector<8x16xf32> -> vector<8x16xf32>
    %86 = vector.broadcast %6 : vector<8x1xf32> to vector<8x16xf32>
    %87 = arith.addf %85, %86 : vector<8x16xf32>
    %88 = arith.addf %87, %32 : vector<8x16xf32>
    %c0_34 = arith.constant 0 : index
    %c0_35 = arith.constant 0 : index
    %89 = vector.load %arg8[%c0_34, %c0_35] : memref<8x16xf32, #tpu.memory_space<vmem>>, vector<8x16xf32>
    tpu.vector_store %arg8[%c0_34, %c0_35], %88 {strides = array<i32>} : memref<8x16xf32, #tpu.memory_space<vmem>>, vector<8x16xf32>,
    return
  }
  func.func @transform_0(%arg0: i32) -> (i32, i32) {
    %c0_i32 = arith.constant 0 : i32
    %c0_i32_0 = arith.constant 0 : i32
    return %c0_i32, %arg0 : i32, i32
  }
  func.func @transform_1(%arg0: i32) -> (i32, i32) {
    %c0_i32 = arith.constant 0 : i32
    %c0_i32_0 = arith.constant 0 : i32
    return %c0_i32, %arg0 : i32, i32
  }
  func.func @transform_2(%arg0: i32) -> (i32, i32) {
    %c0_i32 = arith.constant 0 : i32
    %c0_i32_0 = arith.constant 0 : i32
    %c0_i32_1 = arith.constant 0 : i32
    return %c0_i32, %c0_i32_0 : i32, i32
  }
  func.func @transform_3(%arg0: i32) -> (i32, i32) {
    %c0_i32 = arith.constant 0 : i32
    %c0_i32_0 = arith.constant 0 : i32
    %c0_i32_1 = arith.constant 0 : i32
    return %c0_i32, %c0_i32_0 : i32, i32
  }
  func.func @transform_4(%arg0: i32) -> (i32, i32) {
    %c0_i32 = arith.constant 0 : i32
    %c0_i32_0 = arith.constant 0 : i32
    %c0_i32_1 = arith.constant 0 : i32
    return %c0_i32, %c0_i32_0 : i32, i32
  }
  func.func @transform_5(%arg0: i32) -> (i32, i32) {
    %c0_i32 = arith.constant 0 : i32
    %c0_i32_0 = arith.constant 0 : i32
    %c0_i32_1 = arith.constant 0 : i32
    return %c0_i32, %c0_i32_0 : i32, i32
  }
  func.func @transform_6(%arg0: i32) -> (i32, i32) {
    %c0_i32 = arith.constant 0 : i32
    %c0_i32_0 = arith.constant 0 : i32
    %c0_i32_1 = arith.constant 0 : i32
    return %c0_i32, %c0_i32_0 : i32, i32
  }
  func.func @transform_7(%arg0: i32) -> (i32, i32) {
    %c0_i32 = arith.constant 0 : i32
    %c0_i32_0 = arith.constant 0 : i32
    return %c0_i32, %arg0 : i32, i32
  }
}

</mosaic_0001>

<bundles_post_ra>
// kernel: tpu_custom_call.1
= control target key start
LH: loop header
LB: loop body
LE: loop exit
PB: predicated region body
PF: predicated region fallthrough
CT: control target
= control target key end

     0   :  { %v382_v2 = vmov 0.0   ;;  %vm383_vm1 = vmmov 0   ;;  %vm59_vm3 = vcmask 1041408   ;;  %s464_s0 = inlined_call_operand.vmem [shape: f32[4,16], index: 0, kind: input, shape index: {}]   ;;  %s465_s1 = inlined_call_operand.vmem [shape: f32[4,16], index: 1, kind: input, shape index: {}]   ;;  %s466_s2 = inlined_call_operand.vmem [shape: bf16[8,4], index: 2, kind: input, shape index: {}]   ;;  %s467_s3 = inlined_call_operand.vmem [shape: bf16[12,4], index: 3, kind: input, shape index: {}]   ;;  %s468_s4 = inlined_call_operand.vmem [shape: bf16[8,4], index: 4, kind: input, shape index: {}]   ;;  %s469_s5 = inlined_call_operand.vmem [shape: f32[4,1], index: 5, kind: input, shape index: {}]   ;;  %s470_s6 = inlined_call_operand.vmem [shape: f32[8,1], index: 6, kind: input, shape index: {}]   ;;  %s471_s7 = inlined_call_operand.hbm [shape: f32[8,16], index: 7, kind: output, shape index: {}]  }
   0x1   :  { %v28_v0 = vld [vmem:[%s464_s0] sm:$0xf]  ;;  %333 = vmatprep.subr.bf16.mxu1 %v382_v2  ;;  %327 = vmatprep.subr.bf16.mxu0 %v382_v2 }
   0x2   :  { %v29_v1 = vld [vmem:[%s465_s1] sm:$0xf]  ;;  %vm103_vm0 = vcmp.gt.f32.partialorder %v28_v0, 0.0  ;;  %v104_v3 = vmul.f32 0.2, %v28_v0  ;;  %335 = vmatprep.mubr.msk.bf16.mxu1 %vm383_vm1, %v382_v2  ;;  %329 = vmatprep.mubr.msk.bf16.mxu0 %vm383_vm1, %v382_v2 }
   0x3   :  { %v52_v4 = vadd.f32 %v29_v1, %v28_v0  ;;  %vm106_vm2 = vcmp.gt.f32.partialorder %v29_v1, 0.0  ;;  %v107_v7 = vmul.f32 0.2, %v29_v1 }
   0x4   :  { %v105_v5 = vsel %vm103_vm0, %v28_v0, %v104_v3 }
   0x5   :  { %v53_v6 = vmul.f32 0.5, %v52_v4  ;;  %v109_v8 = vpack.c.bf16 %v105_v5, %v105_v5 }
   0x6   :  { %12 = vsyncpa [#allocation3], 0  ;;  %v108_v10 = vsel %vm106_vm2, %v29_v1, %v107_v7  ;;  %v359_v12 = vld [vmem:[%s467_s3] sm:$0x3f]   ;;  %vm55_vm4 = vcmask 31744   ;;  %v384_v17 = vmov 0   ;;  %v36_v34 = vlaneseq }
   0x7   :  { %v54_v9 = vpack.c.bf16 %v53_v6, %v53_v6  ;;  %v119_v11 = vsel %vm59_vm3, %v109_v8, 0  ;;  %v162_v13 = vpack.c.bf16 %v108_v10, %v108_v10  ;;  %v30_v15 = vld [vmem:[%s466_s2] sm:$0xf]  ;;  %357 = vset.pattern.permute.xlu0 %v384_v17  ;;  %358 = vset.pattern.permute.xlu1 %v384_v17  ;;  %s385_s2 = smov 127   ;;  %s386_s3 = smov 1   ;;  %vm211_vm5 = vcmask 7168  }
   0x8   :  { %334 = vmatpush3.bf16.msra.mxu1 %v119_v11  ;;  %v34_v29 = vld [vmem:[%s469_s5] sm:$0xf]  ;;  %v37_v35 = vand.u32 127, %v36_v34  ;;  %vm232_vm7 = vcmask 121856   ;;  %s387_s11 = smov [#allocation2]   ;;  %vm298_vm11 = vcmask 130048  }
   0x9   :  { %v61_v14 = vsel %vm59_vm3, %v54_v9, 0  ;;  %345 = vmatprep.subr.bf16.mxu1 %v382_v2  ;;  %v164_v16 = vsel %vm59_vm3, %v162_v13, 0  ;;  %v35_v33 = vld [vmem:[%s470_s6] sm:$0xff]  ;;  %s306_s12 = sshll.u32 %s387_s11, 4  ;;  %s307_s12 = int_to_ptr.vmem [resolvable:$true] %s306_s12 }
   0xa   :  { %328 = vmatpush3.bf16.msra.mxu0 %v61_v14  ;;  %v42_v36 = vand.u32 7, %v37_v35  ;;  %v33_v58 = vld [vmem:[%s468_s4] sm:$0xf]  ;;  %s360_s13 = scalar_lea.vmem %s307_s12, 128  ;;  %p365_p1 = scmp.lt.s32.totalorder %s307_s12, %s307_s12 }
   0xb   :  { %339 = vmatprep.subr.bf16.mxu0 %v382_v2  ;;  %336 = vmatmul.mubr.msk.bf16.vlgmr.msra.gmra.mxu1 %vm55_vm4, %v359_v12  ;;  %p361_p0 = scmp.ne.s32.totalorder %s307_s12, %s360_s13  ;;  %p366_p2 = scmp.lt.s32.totalorder %s360_s13, %s360_s13 }
   0xc   :  { %347 = vmatprep.mubr.msk.bf16.mxu1 %vm383_vm1, %v382_v2  ;;  %vm50_vm6 = vcmp.eq.s32.totalorder %v42_v36, 0  ;;  %vm51_vm8 = vcmp.eq.s32.totalorder %v42_v36, 7 }
   0xd   :  { %330 = vmatmul.mubr.msk.bf16.vlgmr.msra.gmra.mxu0 %vm55_vm4, %v30_v15  ;;  %p367_p3 = por %p366_p2, %p365_p1 }
   0xe   :  { %340 = vmatpush3.bf16.msra.mxu0 %v164_v16  ;;  %341 = vmatprep.mubr.msk.bf16.mxu0 %vm383_vm1, %v382_v2 }
   0xf   :  { %p368_p4 = pnand %p367_p3, %p361_p0 }
  0x15   :  { %342 = vmatmul.mubr.msk.bf16.vlgmr.msra.gmra.mxu0 %vm55_vm4, %v359_v12 }
  0xcb   :  { %v155_v18 = vpop.f32.mrf.mxu1 }
  0xcc   :  { %v215_v41 = vrot.slane %v155_v18, 4 }
  0xcd   :  { %v97_v19 = vpop.f32.mrf.mxu0  ;;  %v337_v20 = vpop.f32.mrf.mxu1 }
  0xcf   :  { %v331_v21 = vpop.f32.mrf.mxu0  ;;  %v158_v22 = vpop.f32.mrf.mxu1 }
  0xd0   :  { %229 = vrot.lane.b32.xlu1 %v158_v22, %s385_s2 }
  0xd1   :  { %v100_v23 = vpop.f32.mrf.mxu0  ;;  %v338_v24 = vpop.f32.mrf.mxu1 }
  0xd3   :  { %v332_v25 = vpop.f32.mrf.mxu0 }
  0xd4   :  { %248 = vperm.xlu1 %358, %v35_v33  }
  0xd5   :  { %v200_v26 = vpop.f32.mrf.mxu0 }
  0xd6   :  { %v225_v27 = vrot.slane %v200_v26, 4  ;;  %208 = vrot.lane.b32.xlu0 %v200_v26, %s386_s3 }
  0xd7   :  { %v343_v28 = vpop.f32.mrf.mxu0 }
  0xd8   :  { %v227_v30 = vadd.f32 %v225_v27, %v155_v18 }
  0xd9   :  { %v203_v31 = vpop.f32.mrf.mxu0 }
  0xda   :  { %221 = vperm.xlu0 %357, %v34_v29  }
  0xdb   :  { %v344_v32 = vpop.f32.mrf.mxu0 }
 0x142   :  { %v230_v39 = vpop.permute.xlu1 %229 }
 0x143   :  { %v233_v42 = vsel %vm232_vm7, %v230_v39, 0.0 }
 0x144   :  { %v234_v44 = vsel %vm51_vm8, 0.0, %v233_v42 }
 0x145   :  { %v235_v46 = vadd.f32 %v234_v44, %v227_v30 }
 0x148   :  { %v209_v37 = vpop.permute.xlu0 %208 }
 0x149   :  { %v212_v38 = vsel %vm211_vm5, 0.0, %v209_v37 }
 0x14a   :  { %v213_v40 = vsel %vm50_vm6, 0.0, %v212_v38 }
 0x14b   :  { %v217_v43 = vadd.f32 %v215_v41, %v213_v40 }
 0x14d   :  { %v218_v45 = vadd.f32 %v217_v43, %v203_v31 }
 0x14f   :  { %v249_v59 = vpop.permute.xlu1 %248 }
 0x155   :  { %v222_v47 = vpop.permute.xlu0 %221 }
 0x156   :  { %v224_v48 = vadd.f32 %v222_v47, %v218_v45  ;;  %v236_v49 = vadd.f32 %v235_v46, %v222_v47 }
 0x158   :  { %vm237_vm9 = vcmp.gt.f32.partialorder %v224_v48, 0.0  ;;  %v238_v50 = vmul.f32 0.2, %v224_v48  ;;  %vm240_vm10 = vcmp.gt.f32.partialorder %v236_v49, 0.0  ;;  %v241_v51 = vmul.f32 0.2, %v236_v49 }
 0x15a   :  { %v239_v52 = vsel %vm237_vm9, %v224_v48, %v238_v50  ;;  %v242_v53 = vsel %vm240_vm10, %v236_v49, %v241_v51 }
 0x15b   :  { %v243_v54 = vadd.f32 %v242_v53, %v239_v52 }
 0x15d   :  { %v244_v55 = vmul.f32 0.5, %v243_v54 }
 0x15f   :  { %v245_v56 = vpack.c.bf16 %v244_v55, %v244_v55 }
 0x161   :  { %v255_v57 = vsel %vm59_vm3, %v245_v56, 0 }
 0x162   :  { %346 = vmatpush3.bf16.msra.mxu1 %v255_v57 }
 0x165   :  { %348 = vmatmul.mubr.msk.bf16.vlgmr.msra.gmra.mxu1 %vm55_vm4, %v33_v58 }
 0x225   :  { %v291_v60 = vpop.f32.mrf.mxu1 }
 0x226   :  { %v292_v61 = vadd.f32 %v291_v60, %v249_v59 }
 0x227   :  { %v349_v62 = vpop.f32.mrf.mxu1 }
 0x228   :  { %v297_v63 = vadd.f32 %v292_v61, %v97_v19 }
 0x229   :  { %v294_v0 = vpop.f32.mrf.mxu1 }
 0x22a   :  { %299 = vst.msk [vmem:[#allocation2] sm:$0xff] %vm298_vm11, %v297_v63 }
 0x22b   :  { %v350_v1 = vpop.f32.mrf.mxu1 }
 0x22c   :  { %371 = shalt.err (!%p368_p4)
}
 0x22d   :  { %309 = dma.vmem_to_hbm [thread:$0]  %s307_s12, 128, %s471_s7, [#allocation3]  }
 0x22e   :  { %380 = dma.done.wait [#allocation3], 128  }
 0x22f   :  { %381 = vsyncadd [#allocation3], 4294967168 }
 0x230   :  { %313 = vsyncpa [#allocation3], 1 }

</bundles_post_ra>
